<compile_context>
chip_gen: v7x
topology: tpu7x:2x2x1
jax: 0.10.0
libtpu: 0.0.40
codegen_flags: <defaults>
</compile_context>

<pallas_src>
import numpy as np
import jax
import jax.numpy as jnp
from jax import lax
from jax.experimental import pallas as pl
from jax.experimental.pallas import tpu as pltpu

F32 = jnp.float32
BF16 = jnp.bfloat16
LANE = 128


def _round_up(x, m):
    return ((x + m - 1) // m) * m


def _pick_tile(n, pref=256):
    """Largest legal row tile <= pref that divides n (full extent if n small)."""
    if n <= pref:
        return n
    for t in (pref, 128, 64, 32, 16, 8):
        if n % t == 0:
            return t
    return n


# ---------------------------------------------------------------------------
# Padding helpers (zero padding of the feature axis to Ep = round_up(E, 128)).
# In production this is done once at parameter-load time.
# ---------------------------------------------------------------------------
def _pad_last(a, target):
    pad = target - a.shape[-1]
    if pad == 0:
        return a
    widths = [(0, 0)] * (a.ndim - 1) + [(0, pad)]
    return jnp.pad(a, widths)


def _pad_lstm_weight(w, E, Ep):
    """(4E, E) PyTorch LSTM weight -> transposed, gate-block padded (Ep, 4Ep)."""
    w4 = w.reshape(4, E, E)
    w4p = jnp.pad(w4, ((0, 0), (0, Ep - E), (0, Ep - E)))
    return jnp.transpose(w4p, (2, 0, 1)).reshape(Ep, 4 * Ep)


def _pad_lstm_bias(b, E, Ep):
    b4 = b.reshape(4, E)
    return jnp.pad(b4, ((0, 0), (0, Ep - E))).reshape(1, 4 * Ep)


def _split_pad_weight(w, E, Ep):
    """(E, 2E) Linear(2E->E) weight -> (wa, wb) each (Ep, Ep) so that
    cat(x1, x2) @ w.T == x1 @ wa + x2 @ wb."""
    wt = w.T
    wa = jnp.pad(wt[:E, :], ((0, Ep - E), (0, Ep - E)))
    wb = jnp.pad(wt[E:, :], ((0, Ep - E), (0, Ep - E)))
    return wa, wb


# ---------------------------------------------------------------------------
# Kernel 1a: LSTM input projection (hoisted out of the recurrence).
#   xproj[t, n, :] = x[t, n, :] @ W_ih^T + (b_ih + b_hh)      (stored bf16)
# ---------------------------------------------------------------------------
def _lstm_proj_kernel(x_ref, w_ref, b_ref, out_ref):
    out_ref[...] = (
        jnp.dot(x_ref[...], w_ref[...], preferred_element_type=F32) + b_ref[...]
    ).astype(out_ref.dtype)


def lstm_input_projection(seq_bf16, w_ih_t_p, bias_p):
    T, N, Ep = seq_bf16.shape
    G4 = w_ih_t_p.shape[1]
    rows = T * N
    rt = _pick_tile(rows, 256)
    out = pl.pallas_call(
        _lstm_proj_kernel,
        out_shape=jax.ShapeDtypeStruct((rows, G4), BF16),
        grid=(rows // rt,),
        in_specs=[
            pl.BlockSpec((rt, Ep), lambda i: (i, 0)),
            pl.BlockSpec((Ep, G4), lambda i: (0, 0)),
            pl.BlockSpec((1, G4), lambda i: (0, 0)),
        ],
        out_specs=pl.BlockSpec((rt, G4), lambda i: (i, 0)),
        compiler_params=pltpu.CompilerParams(dimension_semantics=("parallel",)),
    )(seq_bf16.reshape(rows, Ep), w_ih_t_p.astype(BF16), bias_p.astype(F32))
    return out.reshape(T, N, G4)


# ---------------------------------------------------------------------------
# Kernel 1b: LSTM recurrence.  grid=(N//nb, T): leading "parallel" batch axis
# (megacore), trailing "arbitrary" time axis; h/c in VMEM scratch per block.
# Returns h at the last valid timestep of each sequence (pack_padded + h_n).
# ---------------------------------------------------------------------------
def _lstm_rec_kernel(len_ref, xproj_ref, whh_ref, h_out_ref, h_sc, c_sc):
    Ep = h_sc.shape[-1]
    t = pl.program_id(1)

    @pl.when(t == 0)
    def _():
        h_sc[...] = jnp.zeros_like(h_sc)
        c_sc[...] = jnp.zeros_like(c_sc)

    gates = xproj_ref[0] + jnp.dot(
        h_sc[...].astype(BF16), whh_ref[...], preferred_element_type=F32
    )  # [nb, 4Ep], PyTorch gate order i, f, g, o (each block lane-aligned)
    i = jax.nn.sigmoid(gates[:, 0:Ep])
    f = jax.nn.sigmoid(gates[:, Ep:2 * Ep])
    g = jnp.tanh(gates[:, 2 * Ep:3 * Ep])
    o = jax.nn.sigmoid(gates[:, 3 * Ep:4 * Ep])
    c_new = f * c_sc[...] + i * g
    h_new = o * jnp.tanh(c_new)
    valid = len_ref[...] > t                     # [nb, 1]: advance unfinished seqs
    h_sc[...] = jnp.where(valid, h_new, h_sc[...])
    c_sc[...] = jnp.where(valid, c_new, c_sc[...])

    @pl.when(t == pl.num_programs(1) - 1)
    def _():
        h_out_ref[...] = h_sc[...]


def lstm_recurrence(xproj, lengths, w_hh_t_p):
    T, N, G4 = xproj.shape
    Ep = G4 // 4
    nb = _pick_tile(N, 256)
    return pl.pallas_call(
        _lstm_rec_kernel,
        out_shape=jax.ShapeDtypeStruct((N, Ep), F32),
        grid=(N // nb, T),
        in_specs=[
            pl.BlockSpec((nb, 1), lambda n, t: (n, 0)),
            pl.BlockSpec((1, nb, G4), lambda n, t: (t, n, 0)),
            pl.BlockSpec((Ep, G4), lambda n, t: (0, 0)),
        ],
        out_specs=pl.BlockSpec((nb, Ep), lambda n, t: (n, 0)),
        scratch_shapes=[pltpu.VMEM((nb, Ep), F32), pltpu.VMEM((nb, Ep), F32)],
        compiler_params=pltpu.CompilerParams(
            dimension_semantics=("parallel", "arbitrary")),
    )(lengths.reshape(N, 1).astype(jnp.int32), xproj, w_hh_t_p.astype(BF16))


# ---------------------------------------------------------------------------
# Kernel 2: fused edge-MLP projection + friend replacement (row-tiled).
#   A = U @ (W1a + W1b) + b1,  B = U @ W1b      (for edge scores)
#   rep = where(is_core, U, relu(long @ w1a + U @ w1b))
# ---------------------------------------------------------------------------
def _edge_friend_kernel(short_ref, long_ref, core_ref, wab_ref, wb_ref, b1_ref,
                        w1a_ref, w1b_ref, a_ref, b_ref, rep_ref):
    s = short_ref[...]
    s16 = s.astype(BF16)
    l16 = long_ref[...].astype(BF16)
    a_ref[...] = jnp.dot(s16, wab_ref[...], preferred_element_type=F32) + b1_ref[...]
    b_ref[...] = jnp.dot(s16, wb_ref[...], preferred_element_type=F32)
    fr = jnp.maximum(
        jnp.dot(l16, w1a_ref[...], preferred_element_type=F32)
        + jnp.dot(s16, w1b_ref[...], preferred_element_type=F32),
        0.0,
    )
    rep_ref[...] = jnp.where(core_ref[...] > 0, s, fr)


def edge_friend(shortterm, longterm, is_core, wab, wb, b1, w1a, w1b):
    N, Ep = shortterm.shape
    rt = _pick_tile(N, 256)
    row_spec = pl.BlockSpec((rt, Ep), lambda i: (i, 0))
    w_spec = pl.BlockSpec((Ep, Ep), lambda i: (0, 0))
    return pl.pallas_call(
        _edge_friend_kernel,
        out_shape=(jax.ShapeDtypeStruct((N, Ep), F32),) * 3,
        grid=(N // rt,),
        in_specs=[
            row_spec,                                   # shortterm
            row_spec,                                   # longterm
            pl.BlockSpec((rt, 1), lambda i: (i, 0)),    # is_core
            w_spec, w_spec,                             # wab, wb
            pl.BlockSpec((1, Ep), lambda i: (0, 0)),    # b1
            w_spec, w_spec,                             # w1a, w1b
        ],
        out_specs=(row_spec, row_spec, row_spec),
        compiler_params=pltpu.CompilerParams(dimension_semantics=("parallel",)),
    )(shortterm, longterm, is_core.reshape(N, 1).astype(jnp.int32),
      wab.astype(BF16), wb.astype(BF16), b1.astype(F32),
      w1a.astype(BF16), w1b.astype(BF16))


# ---------------------------------------------------------------------------
# Kernel 3: dense [dst, src] edge scores, tiled over BOTH dst and src; inner
# 8-row sub-loop bounds the relu broadcast intermediate to (8, ts, Ep).
#   interact[dst, src] = relu(A[src] - B[dst]) . w2
# TODO(synk): the E-contraction is a VPU multiply + lane reduce; an MXU
# formulation needs a lane relayout of the (td*ts, 1) result - revisit.
# ---------------------------------------------------------------------------
def _edge_score_kernel(a_ref, b_ref, w2_ref, out_ref):
    td = b_ref.shape[0]
    sub = 8 if td % 8 == 0 else td
    a = a_ref[...]                       # (ts, Ep) src block
    w2 = w2_ref[...]                     # (1, Ep)

    def body(i, carry):
        r0 = pl.multiple_of(i * sub, sub)
        bsub = b_ref[pl.ds(r0, sub), :]                              # (sub, Ep)
        h = jnp.maximum(a[None, :, :] - bsub[:, None, :], 0.0)       # (sub, ts, Ep)
        out_ref[pl.ds(r0, sub), :] = jnp.sum(h * w2[None, :, :], axis=-1)
        return carry

    lax.fori_loop(0, td // sub, body, 0)


def edge_scores(A, B, w2_row):
    N, Ep = A.shape
    td = _pick_tile(N, 128)
    ts = _pick_tile(N, 256)
    return pl.pallas_call(
        _edge_score_kernel,
        out_shape=jax.ShapeDtypeStruct((N, N), F32),
        grid=(N // td, N // ts),
        in_specs=[
            pl.BlockSpec((ts, Ep), lambda i, j: (j, 0)),   # src block (b1 folded)
            pl.BlockSpec((td, Ep), lambda i, j: (i, 0)),   # dst block
            pl.BlockSpec((1, Ep), lambda i, j: (0, 0)),
        ],
        out_specs=pl.BlockSpec((td, ts), lambda i, j: (i, j)),
        compiler_params=pltpu.CompilerParams(
            dimension_semantics=("parallel", "parallel")),
    )(A, B, w2_row.astype(F32))


# ---------------------------------------------------------------------------
# Kernel 4: pseudo-adjacency + normalisation coefficient, row-tiled.
# The top-k mask is built in-kernel from the [N, k] indices (iota compare) -
# no dense [N,N] scatter in XLA.  pseudo emitted as bf16 (GCN stream), coef
# computed in f32 before the cast.
# ---------------------------------------------------------------------------
def pseudo_adjacency(interact, initial, topk_idx, keep_rate):
    N = interact.shape[0]
    k = topk_idx.shape[1]
    td = _pick_tile(N, 256)
    kr = float(keep_rate)                 # static hyper-parameter, baked in

    def kernel(interact_ref, initial_ref, idx_ref, pseudo_ref, coef_ref):
        tdk, Nn = interact_ref.shape
        col = lax.broadcasted_iota(jnp.int32, (tdk, Nn), 1)
        idx = idx_ref[...]
        mask = jnp.zeros((tdk, Nn), F32)
        for j in range(k):                                   # k is small & static
            mask = jnp.maximum(mask, (col == idx[:, j:j + 1]).astype(F32))
        p = jax.nn.sigmoid(interact_ref[...] - (1.0 - mask) * 1e11)
        p = (1.0 - kr) * p + kr * initial_ref[...]
        coef_ref[...] = jnp.sum(p, axis=-1, keepdims=True) + 1.0
        pseudo_ref[...] = p.astype(BF16)

    return pl.pallas_call(
        kernel,
        out_shape=(jax.ShapeDtypeStruct((N, N), BF16),
                   jax.ShapeDtypeStruct((N, 1), F32)),
        grid=(N // td,),
        in_specs=[
            pl.BlockSpec((td, N), lambda i: (i, 0)),
            pl.BlockSpec((td, N), lambda i: (i, 0)),
            pl.BlockSpec((td, k), lambda i: (i, 0)),
        ],
        out_specs=(pl.BlockSpec((td, N), lambda i: (i, 0)),
                   pl.BlockSpec((td, 1), lambda i: (i, 0))),
        compiler_params=pltpu.CompilerParams(dimension_semantics=("parallel",)),
    )(interact, initial, topk_idx.astype(jnp.int32))


# ---------------------------------------------------------------------------
# Kernel 5a: ALL GCN layers fused in one pallas_call (grid over L).
# pseudo (bf16) / coef / initial buffer stay VMEM-resident (constant block
# index), the propagated buffer is carried in scratch.  Used when it fits.
#   buffer <- (pseudo @ buffer + buffer) / coef      (L times)
# ---------------------------------------------------------------------------
def _gcn_fused_kernel(pseudo_ref, coef_ref, buf0_ref, out_ref, buf_sc):
    l = pl.program_id(0)

    @pl.when(l == 0)
    def _():
        buf_sc[...] = buf0_ref[...]

    friends = jnp.dot(pseudo_ref[...], buf_sc[...].astype(BF16),
                      preferred_element_type=F32)
    buf_sc[...] = (friends + buf_sc[...]) / coef_ref[...]
    # note: reference GCN computes relu(fc(aggregate)) but discards it; the
    # propagated node feature is `aggregate` itself.

    @pl.when(l == pl.num_programs(0) - 1)
    def _():
        out_ref[...] = buf_sc[...]


def gcn_fused(pseudo, coef, buf0, L):
    N, Ep = buf0.shape
    return pl.pallas_call(
        _gcn_fused_kernel,
        out_shape=jax.ShapeDtypeStruct((N, Ep), F32),
        grid=(L,),
        in_specs=[
            pl.BlockSpec((N, N), lambda l: (0, 0)),
            pl.BlockSpec((N, 1), lambda l: (0, 0)),
            pl.BlockSpec((N, Ep), lambda l: (0, 0)),
        ],
        out_specs=pl.BlockSpec((N, Ep), lambda l: (0, 0)),
        scratch_shapes=[pltpu.VMEM((N, Ep), F32)],
        compiler_params=pltpu.CompilerParams(
            dimension_semantics=("arbitrary",), vmem_limit_bytes=64 << 20),
    )(pseudo, coef, buf0)


# ---------------------------------------------------------------------------
# Kernel 5b: per-layer streaming GCN fallback (row-tiled "parallel").
# self rows are sliced out of the resident full buffer (no duplicate stream).
# ---------------------------------------------------------------------------
def _gcn_layer_kernel(pseudo_ref, coef_ref, buf_ref, out_ref):
    td = out_ref.shape[0]
    r0 = pl.multiple_of(pl.program_id(0) * td, td)
    self_rows = buf_ref[pl.ds(r0, td), :]
    friends = jnp.dot(pseudo_ref[...], buf_ref[...].astype(BF16),
                      preferred_element_type=F32)
    out_ref[...] = (friends + self_rows) / coef_ref[...]


def gcn_layer(pseudo, coef, buf):
    N, Ep = buf.shape
    td = _pick_tile(N, 256)
    return pl.pallas_call(
        _gcn_layer_kernel,
        out_shape=jax.ShapeDtypeStruct((N, Ep), F32),
        grid=(N // td,),
        in_specs=[
            pl.BlockSpec((td, N), lambda i: (i, 0)),     # bf16 pseudo rows
            pl.BlockSpec((td, 1), lambda i: (i, 0)),     # coef rows
            pl.BlockSpec((N, Ep), lambda i: (0, 0)),     # full buffer (resident)
        ],
        out_specs=pl.BlockSpec((td, Ep), lambda i: (i, 0)),
        compiler_params=pltpu.CompilerParams(
            dimension_semantics=("parallel",), vmem_limit_bytes=32 << 20),
    )(pseudo, coef, buf)


# ---------------------------------------------------------------------------
# Kernel 6: final score = softmax(core_repr @ item_emb^T), single pass.
# Logits are written into the resident (C, I) output block per item tile,
# online max/sum-exp stats live in scratch, normalisation at the last tile.
# ---------------------------------------------------------------------------
def _score_softmax_kernel(core_ref, item_ref, out_ref, m_sc, l_sc):
    j = pl.program_id(0)
    ti = item_ref.shape[0]
    logits = lax.dot_general(
        core_ref[...].astype(BF16), item_ref[...],
        dimension_numbers=(((1,), (1,)), ((), ())),
        preferred_element_type=F32,
    )                                                    # (C, ti)
    out_ref[:, pl.ds(pl.multiple_of(j * ti, ti), ti)] = logits
    blk_max = jnp.max(logits, axis=-1, keepdims=True)

    @pl.when(j == 0)
    def _():
        m_sc[...] = blk_max
        l_sc[...] = jnp.sum(jnp.exp(logits - blk_max), axis=-1, keepdims=True)

    @pl.when(j > 0)
    def _():
        m_old = m_sc[...]
        m_new = jnp.maximum(m_old, blk_max)
        l_sc[...] = l_sc[...] * jnp.exp(m_old - m_new) + jnp.sum(
            jnp.exp(logits - m_new), axis=-1, keepdims=True)
        m_sc[...] = m_new

    @pl.when(j == pl.num_programs(0) - 1)
    def _():
        out_ref[...] = jnp.exp(out_ref[...] - m_sc[...]) / l_sc[...]


def score_softmax(core_repr, item_emb_bf16):
    C, Ep = core_repr.shape
    I = item_emb_bf16.shape[0]
    ti = _pick_tile(I, 512)
    return pl.pallas_call(
        _score_softmax_kernel,
        out_shape=jax.ShapeDtypeStruct((C, I), F32),
        grid=(I // ti,),
        in_specs=[
            pl.BlockSpec((C, Ep), lambda j: (0, 0)),
            pl.BlockSpec((ti, Ep), lambda j: (j, 0)),
        ],
        out_specs=pl.BlockSpec((C, I), lambda j: (0, 0)),
        scratch_shapes=[pltpu.VMEM((C, 1), F32), pltpu.VMEM((C, 1), F32)],
        compiler_params=pltpu.CompilerParams(dimension_semantics=("arbitrary",)),
    )(core_repr, item_emb_bf16)


# ---------------------------------------------------------------------------
# Full PROTOTYPE forward (glue in plain JAX, hot paths in the kernels above).
# ---------------------------------------------------------------------------
def prototype_forward(params, graph, keep_rate, L, k_node2choose):
    session = graph["session"]              # [N, T] int32 item ids
    lengths = graph["length"]               # [N]    int32 valid lengths
    node_id = graph["id"]                   # [N]    int32 user ids
    is_core = graph["is_core"]              # [N]    int32 {0,1}
    initial_score = graph["initial_score"]  # [N*N]  float, dst-major edges
    core_index = graph["core_index"]        # static numpy indices of core users

    item_emb = params["item_emb"]
    user_emb = params["user_emb"]
    N, T = session.shape
    E = item_emb.shape[1]
    Ep = _round_up(E, LANE)

    # --- lane-pad parameters to Ep (zeros are exactly preserved end-to-end) --
    item_emb_p = _pad_last(item_emb.astype(F32), Ep)
    user_emb_p = _pad_last(user_emb.astype(F32), Ep)
    w_ih_t = _pad_lstm_weight(params["lstm_w_ih"], E, Ep)
    w_hh_t = _pad_lstm_weight(params["lstm_w_hh"], E, Ep)
    lstm_bias = _pad_lstm_bias(params["lstm_b_ih"] + params["lstm_b_hh"], E, Ep)
    wa, wb = _split_pad_weight(params["mlp_w1"], E, Ep)
    wab = wa + wb
    b1 = _pad_last(params["mlp_b1"].reshape(1, E).astype(F32), Ep)
    w2_row = _pad_last(params["mlp_w2"].reshape(1, E).astype(F32), Ep)
    w1a, w1b = _split_pad_weight(params["W1"], E, Ep)

    # --- LSTM over sessions -> short-term representation --------------------
    seq = jnp.take(item_emb_p, session, axis=0)              # [N, T, Ep]
    seq = jnp.transpose(seq, (1, 0, 2)).astype(BF16)         # [T, N, Ep]
    xproj = lstm_input_projection(seq, w_ih_t, lstm_bias)    # [T, N, 4Ep] bf16
    shortterm = lstm_recurrence(xproj, lengths, w_hh_t)      # [N, Ep] f32

    # --- fused edge projection + friend (non-core) replacement --------------
    longterm = jnp.take(user_emb_p, node_id, axis=0)         # [N, Ep]
    A, B, user_represent = edge_friend(shortterm, longterm, is_core,
                                       wab, wb, b1, w1a, w1b)

    # --- dense [dst, src] interact scores ------------------------------------
    interact = edge_scores(A, B, w2_row)                     # [N, N]

    # --- top-k (XLA) + in-kernel mask / pseudo-adjacency ---------------------
    initial_mb = initial_score.reshape(N, N).astype(F32)
    _, indices = lax.top_k(interact, k_node2choose)          # [N, k]
    src_id_mb = jnp.broadcast_to(node_id[None, :], (N, N))
    selected_ids = jnp.take_along_axis(src_id_mb, indices, axis=1)
    pseudo, coef = pseudo_adjacency(interact, initial_mb, indices, keep_rate)

    # --- GCN message passing --------------------------------------------------
    # fused-in-VMEM path if pseudo + buffers fit comfortably (sized for v7x's
    # 64 MiB physical VMEM incl. double buffering); else per-layer streaming.
    est_bytes = 2 * (N * N * 2) + 4 * (N * Ep * 4) + (N * Ep * 4)
    if est_bytes <= (40 << 20):
        final_present = gcn_fused(pseudo, coef, user_represent, L)
    else:
        buf = user_represent
        for _ in range(L):
            buf = gcn_layer(pseudo, coef, buf)
        final_present = buf

    # --- core-user readout + softmax scores ----------------------------------
    selected_ids = jnp.take(selected_ids, core_index, axis=0)
    core_user = jnp.take(node_id, core_index, axis=0)
    core_social = jnp.take(final_present, core_index, axis=0)
    core_recent = jnp.take(user_represent, core_index, axis=0)
    core_represent = core_recent + core_social               # [C, Ep]
    score = score_softmax(core_represent, item_emb_p.astype(BF16))  # [C, item_num]
    return score, selected_ids, core_user


# ---------------------------------------------------------------------------
# Pure-JAX f32 reference (mirrors the PyTorch module) for a correctness check.
# ---------------------------------------------------------------------------
def reference_forward(params, graph, keep_rate, L, k):
    item_emb = params["item_emb"]
    user_emb = params["user_emb"]
    session, lengths = graph["session"], graph["length"]
    node_id, is_core = graph["id"], graph["is_core"]
    core_index = graph["core_index"]
    N, T = session.shape
    E = item_emb.shape[1]
    seq = jnp.take(item_emb, session, axis=0)                # [N, T, E]
    w_ih, w_hh = params["lstm_w_ih"], params["lstm_w_hh"]
    b = params["lstm_b_ih"] + params["lstm_b_hh"]

    def step(carry, t):
        h, c = carry
        x = seq[:, t, :]
        gates = x @ w_ih.T + h @ w_hh.T + b
        i = jax.nn.sigmoid(gates[:, :E])
        f = jax.nn.sigmoid(gates[:, E:2 * E])
        g = jnp.tanh(gates[:, 2 * E:3 * E])
        o = jax.nn.sigmoid(gates[:, 3 * E:])
        c_new = f * c + i * g
        h_new = o * jnp.tanh(c_new)
        valid = (lengths > t)[:, None]
        return (jnp.where(valid, h_new, h), jnp.where(valid, c_new, c)), None

    (shortterm, _), _ = lax.scan(step, (jnp.zeros((N, E), F32),
                                        jnp.zeros((N, E), F32)), jnp.arange(T))
    srcr = jnp.broadcast_to(shortterm[None, :, :], (N, N, E))
    diff = srcr - shortterm[:, None, :]
    cat = jnp.concatenate([srcr, diff], axis=-1)
    hid = jnp.maximum(cat @ params["mlp_w1"].T + params["mlp_b1"], 0.0)
    interact = (hid @ params["mlp_w2"].T)[..., 0]            # [dst, src]
    longterm = jnp.take(user_emb, node_id, axis=0)
    fr = jnp.maximum(jnp.concatenate([longterm, shortterm], -1) @ params["W1"].T, 0.0)
    user_rep = jnp.where(is_core[:, None] > 0, shortterm, fr)
    _, indices = lax.top_k(interact, k)
    mask = jnp.zeros((N, N), F32).at[jnp.arange(N)[:, None], indices].set(1.0)
    pseudo = jax.nn.sigmoid(interact - (1.0 - mask) * 1e11)
    pseudo = (1.0 - keep_rate) * pseudo + keep_rate * graph["initial_score"].reshape(N, N)
    coef = pseudo.sum(-1, keepdims=True) + 1.0
    buf = user_rep
    for _ in range(L):
        buf = (pseudo @ buf + buf) / coef
    core_repr = user_rep[core_index] + buf[core_index]
    score = jax.nn.softmax(core_repr @ item_emb.T, axis=-1)
    sel = jnp.take_along_axis(jnp.broadcast_to(node_id[None, :], (N, N)), indices, 1)
    return score, sel[core_index], node_id[core_index]


# ---------------------------------------------------------------------------
if __name__ == "__main__":
    user_num, item_num, E = 8, 16, 32
    L, k_node2choose = 2, 4
    N, T = 8, 6
    keep_rate = 0.25

    key = jax.random.PRNGKey(0)
    keys = jax.random.split(key, 12)

    def init(kk, shape, scale=0.1):
        return jax.random.normal(kk, shape, F32) * scale

    params = dict(
        user_emb=init(keys[0], (user_num, E)),
        item_emb=init(keys[1], (item_num, E)),
        lstm_w_ih=init(keys[2], (4 * E, E)),
        lstm_w_hh=init(keys[3], (4 * E, E)),
        lstm_b_ih=init(keys[4], (4 * E,)),
        lstm_b_hh=init(keys[5], (4 * E,)),
        mlp_w1=init(keys[6], (E, 2 * E)),   # Linear(2E -> E, bias=True)
        mlp_b1=init(keys[7], (E,)),
        mlp_w2=init(keys[8], (1, E)),       # Linear(E -> 1, bias=False)
        W1=init(keys[9], (E, 2 * E)),       # Linear(2E -> E, bias=False)
        # TODO(synk): W2 and per-layer GCN fc weights exist in the reference
        # module but never affect the forward output; omitted here.
    )

    rng = np.random.default_rng(0)
    is_core_np = np.zeros(N, np.int32)
    is_core_np[:2] = 1

    graph = dict(
        session=jnp.asarray(rng.integers(0, item_num, size=(N, T)), jnp.int32),
        length=jnp.asarray(rng.integers(1, T + 1, size=(N,)), jnp.int32),
        id=jnp.arange(N, dtype=jnp.int32),
        is_core=jnp.asarray(is_core_np),
        initial_score=jnp.asarray(rng.random(N * N), F32),   # dense dst-major edges
        core_index=np.nonzero(is_core_np)[0],                # static indices
    )

    score, selected_ids, core_user = prototype_forward(
        params, graph, keep_rate, L, k_node2choose)
    jax.block_until_ready(score)
    jax.block_until_ready(selected_ids)
    jax.block_until_ready(core_user)

    C = int(is_core_np.sum())
    assert score.shape == (C, item_num)
    assert selected_ids.shape == (C, k_node2choose)
    assert bool(jnp.all(jnp.isfinite(score)))
    assert bool(jnp.allclose(jnp.sum(score, axis=-1), 1.0, atol=1e-5))

    ref_score, _ref_sel, ref_core = reference_forward(
        params, graph, keep_rate, L, k_node2choose)
    # bf16 matmuls introduce small drift (top-k ties could also reorder
    # selected_ids), so only the final probabilities are tolerance-checked.
    assert bool(jnp.all(core_user == ref_core))
    max_diff = float(jnp.max(jnp.abs(score - ref_score)))
    assert max_diff < 5e-3, f"score mismatch vs f32 reference: {max_diff}"

    print("KERNEL_OK")
</pallas_src>

<mosaic_0001>
module attributes {stable_mosaic.version = 11 : i64} {
  func.func @_lstm_proj_kernel(%arg0: i32, %arg1: memref<48x128xbf16, #tpu.memory_space<vmem>>, %arg2: memref<128x512xbf16, #tpu.memory_space<vmem>>, %arg3: memref<1x512xf32, #tpu.memory_space<vmem>>, %arg4: memref<48x512xbf16, #tpu.memory_space<vmem>>) attributes {dimension_semantics = [#tpu.dimension_semantics<parallel>], iteration_bounds = array<i64: 1>, scalar_prefetch = 0 : i64, scratch_operands = 0 : i64, tpu.core_type = #tpu.core_type<tc>, window_params = [{transform_indices = @transform_0, window_bounds = array<i64: 48, 128>}, {pipeline_mode = #tpu.pipeline_mode<synchronous>, transform_indices = @transform_1, window_bounds = array<i64: 128, 512>}, {pipeline_mode = #tpu.pipeline_mode<synchronous>, transform_indices = @transform_2, window_bounds = array<i64: 1, 512>}, {transform_indices = @transform_3, window_bounds = array<i64: 48, 512>}]} {
    %c0 = arith.constant 0 : index
    %c0_0 = arith.constant 0 : index
    %0 = vector.load %arg1[%c0, %c0_0] : memref<48x128xbf16, #tpu.memory_space<vmem>>, vector<48x128xbf16>
    %c0_1 = arith.constant 0 : index
    %c0_2 = arith.constant 0 : index
    %1 = vector.load %arg2[%c0_1, %c0_2] : memref<128x512xbf16, #tpu.memory_space<vmem>>, vector<128x512xbf16>
    %cst = arith.constant dense<0.000000e+00> : vector<48x512xf32>
    %2 = tpu.matmul %0, %1, %cst {dimension_numbers = #tpu.dot_dimension_numbers<[1], [0], [0], [1], [0, 0, 1, 1], [], []>} : vector<48x128xbf16>, vector<128x512xbf16>, vector<48x512xf32> -> vector<48x512xf32>
    %c0_3 = arith.constant 0 : index
    %c0_4 = arith.constant 0 : index
    %3 = vector.load %arg3[%c0_3, %c0_4] : memref<1x512xf32, #tpu.memory_space<vmem>>, vector<1x512xf32>
    %4 = vector.broadcast %3 : vector<1x512xf32> to vector<48x512xf32>
    %5 = arith.addf %2, %4 : vector<48x512xf32>
    %6 = arith.truncf %5 : vector<48x512xf32> to vector<48x512xbf16>
    %c0_5 = arith.constant 0 : index
    %c0_6 = arith.constant 0 : index
    %7 = vector.load %arg4[%c0_5, %c0_6] : memref<48x512xbf16, #tpu.memory_space<vmem>>, vector<48x512xbf16>
    tpu.vector_store %arg4[%c0_5, %c0_6], %6 {strides = array<i32>} : memref<48x512xbf16, #tpu.memory_space<vmem>>, vector<48x512xbf16>,
    return
  }
  func.func @transform_0(%arg0: i32) -> (i32, i32) {
    %c0_i32 = arith.constant 0 : i32
    %c0_i32_0 = arith.constant 0 : i32
    return %arg0, %c0_i32 : i32, i32
  }
  func.func @transform_1(%arg0: i32) -> (i32, i32) {
    %c0_i32 = arith.constant 0 : i32
    %c0_i32_0 = arith.constant 0 : i32
    %c0_i32_1 = arith.constant 0 : i32
    return %c0_i32, %c0_i32_0 : i32, i32
  }
  func.func @transform_2(%arg0: i32) -> (i32, i32) {
    %c0_i32 = arith.constant 0 : i32
    %c0_i32_0 = arith.constant 0 : i32
    %c0_i32_1 = arith.constant 0 : i32
    return %c0_i32, %c0_i32_0 : i32, i32
  }
  func.func @transform_3(%arg0: i32) -> (i32, i32) {
    %c0_i32 = arith.constant 0 : i32
    %c0_i32_0 = arith.constant 0 : i32
    return %arg0, %c0_i32 : i32, i32
  }
}

</mosaic_0001>

<bundles_post_ra>
// kernel: tpu_custom_call.1
= control target key start
LH: loop header
LB: loop body
LE: loop exit
PB: predicated region body
PF: predicated region fallthrough
CT: control target
= control target key end

     0   :  { %8 = vsyncpa [#allocation3], 0  ;;  %s795_s0 = inlined_call_operand.hbm [shape: bf16[48,128], index: 0, kind: input, shape index: {}]   ;;  %s796_s1 = inlined_call_operand.hbm [shape: bf16[128,512], index: 1, kind: input, shape index: {}]   ;;  %s797_s2 = inlined_call_operand.vmem [shape: f32[1,512], index: 2, kind: input, shape index: {}]   ;;  %s798_s3 = inlined_call_operand.hbm [shape: bf16[48,512], index: 3, kind: output, shape index: {}]  }
   0x1   :  { %9 = vsyncpa [#allocation6], 0 }
   0x2   :  { %10 = vsyncpa [#allocation4], 0  ;;  %s700_s12 = smov [#allocation2]   ;;  %s628_s16 = scalar_lea.hbm %s795_s0, 384 }
   0x3   :  { %s16_s13 = sshll.u32 %s700_s12, 4  ;;  %p629_p0 = scmp.ne.s32.totalorder %s795_s0, %s628_s16  ;;  %s17_s13 = int_to_ptr.vmem [resolvable:$true] %s16_s13 }
   0x4   :  { %p632_p1 = scmp.lt.u32.totalorder %s628_s16, %s795_s0 }
   0x6   :  { %p634_p2 = pnand %p632_p1, %p629_p0 }
   0x8   :  { %637 = shalt.err (!%p634_p2)
}
   0x9   :  { %s638_s21 = scalar_lea.vmem %s17_s13, 384  ;;  %p643_p4 = scmp.lt.s32.totalorder %s17_s13, %s17_s13 }
   0xa   :  { %p639_p3 = scmp.ne.s32.totalorder %s17_s13, %s638_s21  ;;  %p644_p5 = scmp.lt.s32.totalorder %s638_s21, %s638_s21 }
   0xc   :  { %p645_p6 = por %p644_p5, %p643_p4 }
   0xe   :  { %p646_p7 = pnand %p645_p6, %p639_p3 }
  0x10   :  { %649 = shalt.err (!%p646_p7)
}
  0x11   :  { %s701_s22 = smov 64   ;;  %s702_s23 = smov 4  }
  0x12   :  { %22 = dma.hbm_to_vmem [thread:$0]  %s795_s0, 384, %s17_s13, [#allocation3], %s701_s22, %s701_s22, %s702_s23  }
  0x13   :  { %s703_s26 = smov [#allocation5]   ;;  %s650_s30 = scalar_lea.hbm %s796_s1, 4096 }
  0x14   :  { %s28_s27 = sshll.u32 %s703_s26, 4  ;;  %p651_p8 = scmp.ne.s32.totalorder %s796_s1, %s650_s30  ;;  %s29_s27 = int_to_ptr.vmem [resolvable:$true] %s28_s27 }
  0x15   :  { %p654_p9 = scmp.lt.u32.totalorder %s650_s30, %s796_s1 }
  0x17   :  { %p656_p10 = pnand %p654_p9, %p651_p8 }
  0x19   :  { %659 = shalt.err (!%p656_p10)
}
  0x1a   :  { %s660_s8 = scalar_lea.vmem %s29_s27, 4096  ;;  %p665_p12 = scmp.lt.s32.totalorder %s29_s27, %s29_s27 }
  0x1b   :  { %p661_p11 = scmp.ne.s32.totalorder %s29_s27, %s660_s8  ;;  %p666_p13 = scmp.lt.s32.totalorder %s660_s8, %s660_s8 }
  0x1d   :  { %p667_p0 = por %p666_p13, %p665_p12 }
  0x1f   :  { %p668_p1 = pnand %p667_p0, %p661_p11 }
  0x21   :  { %671 = shalt.err (!%p668_p1)
}
  0x22   :  { %s704_s0 = smov 256   ;;  %s705_s9 = smov 16  }
  0x23   :  { %34 = dma.hbm_to_vmem [thread:$0]  %s796_s1, 4096, %s29_s27, [#allocation6], %s704_s0, %s704_s0, %s705_s9  }
  0x24   :  { %694 = dma.done.wait [#allocation3], 384  }
  0x25   :  { %695 = vsyncadd [#allocation3], 4294966912 }
  0x26   :  { %696 = dma.done.wait [#allocation6], 4096  }
  0x27   :  { %697 = vsyncadd [#allocation6], 4294963200  ;;  %v706_v0 = vmov 0   ;;  %v577_v1 = vld [vmem:[#allocation5 + $0x4] ss:$16 sps:$4 sm:$0xff]   ;;  %v625_v33 = vld [vmem:[#allocation2] sm:$0xff]   ;;  %v84_v36 = vlaneseq }
  0x28   :  { %314 = vmatprep.mubr.bf16.mxu0 %v706_v0  ;;  %377 = vmatprep.mubr.bf16.mxu1 %v706_v0  ;;  %v579_v2 = vld [vmem:[#allocation5 + $0xc] ss:$16 sps:$4 sm:$0xff]   ;;  %v581_v3 = vld [vmem:[#allocation5] ss:$16 sps:$4 sm:$0xff]   ;;  %v582_v4 = vld [vmem:[#allocation5 + $0x8] ss:$16 sps:$4 sm:$0xff]  }
  0x29   :  { %282 = vmatprep.subr.bf16.mxu0 %v577_v1  ;;  %345 = vmatprep.subr.bf16.mxu1 %v579_v2  ;;  %v583_v5 = vld [vmem:[#allocation5 + $0x24] ss:$16 sps:$4 sm:$0xff]   ;;  %v585_v6 = vld [vmem:[#allocation5 + $0x2c] ss:$16 sps:$4 sm:$0xff]   ;;  %v587_v7 = vld [vmem:[#allocation5 + $0x20] ss:$16 sps:$4 sm:$0xff]  }
  0x2a   :  { %283 = vmatpush1.bf16.msra.mxu0 %v581_v3  ;;  %346 = vmatpush1.bf16.msra.mxu1 %v582_v4  ;;  %v588_v8 = vld [vmem:[#allocation5 + $0x28] ss:$16 sps:$4 sm:$0xff]   ;;  %v589_v9 = vld [vmem:[#allocation5 + $0x44] ss:$16 sps:$4 sm:$0xff]   ;;  %v591_v10 = vld [vmem:[#allocation5 + $0x4c] ss:$16 sps:$4 sm:$0xff]  }
  0x2b   :  { %284 = vmatprep.subr.bf16.mxu0 %v583_v5  ;;  %347 = vmatprep.subr.bf16.mxu1 %v585_v6  ;;  %v593_v11 = vld [vmem:[#allocation5 + $0x40] ss:$16 sps:$4 sm:$0xff]   ;;  %v594_v12 = vld [vmem:[#allocation5 + $0x48] ss:$16 sps:$4 sm:$0xff]   ;;  %v595_v13 = vld [vmem:[#allocation5 + $0x64] ss:$16 sps:$4 sm:$0xff]  }
  0x2c   :  { %v597_v14 = vld [vmem:[#allocation5 + $0x6c] ss:$16 sps:$4 sm:$0xff]   ;;  %v599_v15 = vld [vmem:[#allocation5 + $0x60] ss:$16 sps:$4 sm:$0xff]   ;;  %v600_v16 = vld [vmem:[#allocation5 + $0x68] ss:$16 sps:$4 sm:$0xff]  }
  0x2d   :  { %v601_v17 = vld [vmem:[#allocation5 + $0x84] ss:$16 sps:$4 sm:$0xff]   ;;  %v603_v18 = vld [vmem:[#allocation5 + $0x8c] ss:$16 sps:$4 sm:$0xff]   ;;  %v605_v19 = vld [vmem:[#allocation5 + $0x80] ss:$16 sps:$4 sm:$0xff]  }
  0x2e   :  { %285 = vmatpush1.bf16.msra.mxu0 %v587_v7  ;;  %348 = vmatpush1.bf16.msra.mxu1 %v588_v8  ;;  %v606_v20 = vld [vmem:[#allocation5 + $0x88] ss:$16 sps:$4 sm:$0xff]   ;;  %v607_v21 = vld [vmem:[#allocation5 + $0xa4] ss:$16 sps:$4 sm:$0xff]   ;;  %v609_v22 = vld [vmem:[#allocation5 + $0xac] ss:$16 sps:$4 sm:$0xff]  }
  0x2f   :  { %286 = vmatprep.subr.bf16.mxu0 %v589_v9  ;;  %349 = vmatprep.subr.bf16.mxu1 %v591_v10  ;;  %v611_v23 = vld [vmem:[#allocation5 + $0xa0] ss:$16 sps:$4 sm:$0xff]   ;;  %v612_v24 = vld [vmem:[#allocation5 + $0xa8] ss:$16 sps:$4 sm:$0xff]   ;;  %v613_v25 = vld [vmem:[#allocation5 + $0xc4] ss:$16 sps:$4 sm:$0xff]  }
  0x30   :  { %v615_v26 = vld [vmem:[#allocation5 + $0xcc] ss:$16 sps:$4 sm:$0xff]   ;;  %v617_v27 = vld [vmem:[#allocation5 + $0xc0] ss:$16 sps:$4 sm:$0xff]   ;;  %v618_v28 = vld [vmem:[#allocation5 + $0xc8] ss:$16 sps:$4 sm:$0xff]  }
  0x31   :  { %v619_v29 = vld [vmem:[#allocation5 + $0xe4] ss:$16 sps:$4 sm:$0xff]   ;;  %v621_v30 = vld [vmem:[#allocation5 + $0xec] ss:$16 sps:$4 sm:$0xff]   ;;  %v623_v31 = vld [vmem:[#allocation5 + $0xe0] ss:$16 sps:$4 sm:$0xff]  }
  0x32   :  { %287 = vmatpush1.bf16.msra.mxu0 %v593_v11  ;;  %350 = vmatpush1.bf16.msra.mxu1 %v594_v12  ;;  %v624_v32 = vld [vmem:[#allocation5 + $0xe8] ss:$16 sps:$4 sm:$0xff]   ;;  %v626_v34 = vld [vmem:[#allocation2 + $0x8] sm:$0xff]   ;;  %v85_v37 = vshrl.u32 %v84_v36, 7 }
  0x33   :  { %288 = vmatprep.subr.bf16.mxu0 %v595_v13  ;;  %351 = vmatprep.subr.bf16.mxu1 %v597_v14  ;;  %v627_v35 = vld [vmem:[#allocation2 + $0x10] sm:$0xff]   ;;  %v82_v40 = vld [vmem:[%s797_s2] sm:$0xf]  ;;  %s707_s2 = smov [#allocation7]  }
  0x34   :  { %v86_v38 = vsub.s32 0, %v85_v37  ;;  %v94_v39 = vsub.s32 2, %v85_v37  ;;  %v90_v41 = vsub.s32 1, %v85_v37  ;;  %v98_v42 = vsub.s32 3, %v85_v37  ;;  %s497_s13 = sshll.u32 %s707_s2, 4  ;;  %s498_s13 = int_to_ptr.vmem [resolvable:$true] %s497_s13 }
  0x35   :  { %s672_s14 = scalar_lea.vmem %s498_s13, 1536  ;;  %p677_p3 = scmp.lt.s32.totalorder %s498_s13, %s498_s13 }
  0x36   :  { %289 = vmatpush1.bf16.msra.mxu0 %v599_v15  ;;  %352 = vmatpush1.bf16.msra.mxu1 %v600_v16  ;;  %v87_v43 = vrot.slane %v82_v40, %v86_v38  ;;  %v95_v44 = vrot.slane %v82_v40, %v94_v39  ;;  %v764_v45 = vrot.slane %v82_v40, %v90_v41  ;;  %p673_p2 = scmp.ne.s32.totalorder %s498_s13, %s672_s14  ;;  %p678_p4 = scmp.lt.s32.totalorder %s672_s14, %s672_s14 }
  0x37   :  { %290 = vmatprep.subr.bf16.mxu0 %v601_v17  ;;  %353 = vmatprep.subr.bf16.mxu1 %v603_v18  ;;  %v766_v46 = vrot.slane %v82_v40, %v98_v42 }
  0x38   :  { %p679_p5 = por %p678_p4, %p677_p3 }
  0x3a   :  { %291 = vmatpush1.bf16.msra.mxu0 %v605_v19  ;;  %354 = vmatpush1.bf16.msra.mxu1 %v606_v20  ;;  %p680_p6 = pnand %p679_p5, %p673_p2 }
  0x3b   :  { %292 = vmatprep.subr.bf16.mxu0 %v607_v21  ;;  %355 = vmatprep.subr.bf16.mxu1 %v609_v22 }
  0x3e   :  { %293 = vmatpush1.bf16.msra.mxu0 %v611_v23  ;;  %356 = vmatpush1.bf16.msra.mxu1 %v612_v24 }
  0x3f   :  { %294 = vmatprep.subr.bf16.mxu0 %v613_v25  ;;  %357 = vmatprep.subr.bf16.mxu1 %v615_v26 }
  0x42   :  { %295 = vmatpush1.bf16.msra.mxu0 %v617_v27  ;;  %358 = vmatpush1.bf16.msra.mxu1 %v618_v28 }
  0x43   :  { %296 = vmatprep.subr.bf16.mxu0 %v619_v29  ;;  %359 = vmatprep.subr.bf16.mxu1 %v621_v30 }
  0x46   :  { %297 = vmatpush1.bf16.msra.mxu0 %v623_v31  ;;  %360 = vmatpush1.bf16.msra.mxu1 %v624_v32 }
  0x49   :  { %315 = vmatmul.mubr.bf16.vlgmr.msra.gmra.mrb[0].mxu0 %v625_v33  ;;  %378 = vmatmul.mubr.bf16.vlgmr.msra.gmra.mrb[0].mxu1 %v625_v33 }
  0x4a   :  { %324 = vmatprep.mubr.bf16.mxu0 %v706_v0  ;;  %387 = vmatprep.mubr.bf16.mxu1 %v706_v0 }
  0x51   :  { %325 = vmatmul.mubr.bf16.gmra.mrb[4].mxu0 %v626_v34  ;;  %388 = vmatmul.mubr.bf16.gmra.mrb[4].mxu1 %v626_v34 }
  0x52   :  { %334 = vmatprep.mubr.bf16.mxu0 %v706_v0  ;;  %397 = vmatprep.mubr.bf16.mxu1 %v706_v0 }
  0x59   :  { %335 = vmatmul.mubr.bf16.gmra.mrb[8].mxu0 %v627_v35  ;;  %398 = vmatmul.mubr.bf16.gmra.mrb[8].mxu1 %v627_v35 }
 0x11c   :  { %v316_v47 = vpop.f32.mrb[0].mxu0  ;;  %v379_v48 = vpop.f32.mrb[0].mxu1 }
 0x11d   :  { %v317_v49 = vadd.f32 %v316_v47, %v87_v43  ;;  %v380_v50 = vadd.f32 %v379_v48, %v95_v44  ;;  %v318_v51 = vpop.f32.mrb[1].mxu0  ;;  %v381_v52 = vpop.f32.mrb[1].mxu1 }
 0x11e   :  { %v319_v53 = vadd.f32 %v318_v51, %v764_v45  ;;  %v382_v54 = vadd.f32 %v381_v52, %v766_v46  ;;  %v320_v55 = vpop.f32.mrb[2].mxu0  ;;  %v383_v56 = vpop.f32.mrb[2].mxu1 }
 0x11f   :  { %v321_v57 = vadd.f32 %v320_v55, %v87_v43  ;;  %v384_v58 = vadd.f32 %v383_v56, %v95_v44  ;;  %v322_v59 = vpop.f32.mrb[3].mxu0  ;;  %v385_v60 = vpop.f32.mrb[3].mxu1 }
 0x120   :  { %v557_v61 = vpack.c.bf16 %v319_v53, %v317_v49  ;;  %v558_v62 = vpack.c.bf16 %v382_v54, %v380_v50  ;;  %v323_v63 = vadd.f32 %v322_v59, %v764_v45  ;;  %v386_v0 = vadd.f32 %v385_v60, %v766_v46 }
 0x122   :  { %480 = vst [vmem:[#allocation7] sm:$0xff] %v557_v61  ;;  %481 = vst [vmem:[#allocation7 + $0x8] sm:$0xff] %v558_v62  ;;  %v559_v1 = vpack.c.bf16 %v323_v63, %v321_v57  ;;  %v560_v2 = vpack.c.bf16 %v386_v0, %v384_v58 }
 0x124   :  { %482 = vst [vmem:[#allocation7 + $0x10] sm:$0xff] %v559_v1  ;;  %483 = vst [vmem:[#allocation7 + $0x18] sm:$0xff] %v560_v2  ;;  %v326_v3 = vpop.f32.mrb[4].mxu0  ;;  %v389_v4 = vpop.f32.mrb[4].mxu1 }
 0x125   :  { %v327_v5 = vadd.f32 %v326_v3, %v87_v43  ;;  %v390_v6 = vadd.f32 %v389_v4, %v95_v44  ;;  %v328_v7 = vpop.f32.mrb[5].mxu0  ;;  %v391_v8 = vpop.f32.mrb[5].mxu1 }
 0x126   :  { %v329_v9 = vadd.f32 %v328_v7, %v764_v45  ;;  %v392_v10 = vadd.f32 %v391_v8, %v766_v46  ;;  %v330_v11 = vpop.f32.mrb[6].mxu0  ;;  %v393_v12 = vpop.f32.mrb[6].mxu1 }
 0x127   :  { %v331_v13 = vadd.f32 %v330_v11, %v87_v43  ;;  %v394_v14 = vadd.f32 %v393_v12, %v95_v44  ;;  %v332_v15 = vpop.f32.mrb[7].mxu0  ;;  %v395_v16 = vpop.f32.mrb[7].mxu1 }
 0x128   :  { %v561_v17 = vpack.c.bf16 %v329_v9, %v327_v5  ;;  %v562_v18 = vpack.c.bf16 %v392_v10, %v390_v6  ;;  %v333_v19 = vadd.f32 %v332_v15, %v764_v45  ;;  %v396_v20 = vadd.f32 %v395_v16, %v766_v46 }
 0x12a   :  { %484 = vst [vmem:[#allocation7 + $0x20] sm:$0xff] %v561_v17  ;;  %485 = vst [vmem:[#allocation7 + $0x28] sm:$0xff] %v562_v18  ;;  %v563_v21 = vpack.c.bf16 %v333_v19, %v331_v13  ;;  %v564_v22 = vpack.c.bf16 %v396_v20, %v394_v14 }
 0x12c   :  { %486 = vst [vmem:[#allocation7 + $0x30] sm:$0xff] %v563_v21  ;;  %487 = vst [vmem:[#allocation7 + $0x38] sm:$0xff] %v564_v22  ;;  %v336_v23 = vpop.f32.mrb[8].mxu0  ;;  %v399_v24 = vpop.f32.mrb[8].mxu1 }
 0x12d   :  { %v337_v25 = vadd.f32 %v336_v23, %v87_v43  ;;  %v400_v26 = vadd.f32 %v399_v24, %v95_v44  ;;  %v338_v27 = vpop.f32.mrb[9].mxu0  ;;  %v401_v28 = vpop.f32.mrb[9].mxu1 }
 0x12e   :  { %v339_v29 = vadd.f32 %v338_v27, %v764_v45  ;;  %v402_v30 = vadd.f32 %v401_v28, %v766_v46  ;;  %v340_v31 = vpop.f32.mrb[10].mxu0  ;;  %v403_v32 = vpop.f32.mrb[10].mxu1 }
 0x12f   :  { %v341_v33 = vadd.f32 %v340_v31, %v87_v43  ;;  %v404_v34 = vadd.f32 %v403_v32, %v95_v44  ;;  %v342_v35 = vpop.f32.mrb[11].mxu0  ;;  %v405_v36 = vpop.f32.mrb[11].mxu1 }
 0x130   :  { %v565_v37 = vpack.c.bf16 %v339_v29, %v337_v25  ;;  %v566_v38 = vpack.c.bf16 %v402_v30, %v400_v26  ;;  %v343_v39 = vadd.f32 %v342_v35, %v764_v45  ;;  %v406_v40 = vadd.f32 %v405_v36, %v766_v46 }
 0x132   :  { %488 = vst [vmem:[#allocation7 + $0x40] sm:$0xff] %v565_v37  ;;  %489 = vst [vmem:[#allocation7 + $0x48] sm:$0xff] %v566_v38  ;;  %v567_v41 = vpack.c.bf16 %v343_v39, %v341_v33  ;;  %v568_v42 = vpack.c.bf16 %v406_v40, %v404_v34 }
 0x134   :  { %490 = vst [vmem:[#allocation7 + $0x50] sm:$0xff] %v567_v41  ;;  %491 = vst [vmem:[#allocation7 + $0x58] sm:$0xff] %v568_v42 }
 0x135   :  { %683 = shalt.err (!%p680_p6)
}
 0x136   :  { %s684_s17 = scalar_lea.hbm %s798_s3, 1536 }
 0x137   :  { %p685_p7 = scmp.ne.s32.totalorder %s798_s3, %s684_s17  ;;  %p688_p8 = scmp.lt.u32.totalorder %s684_s17, %s798_s3 }
 0x139   :  { %p690_p9 = pnand %p688_p8, %p685_p7 }
 0x13b   :  { %693 = shalt.err (!%p690_p9)
}
 0x13c   :  { %503 = dma.vmem_to_hbm [thread:$0]  %s498_s13, 1536, %s798_s3, [#allocation4], %s704_s0, %s704_s0, %s705_s9  }
 0x13d   :  { %698 = dma.done.wait [#allocation4], 1536  }
 0x13e   :  { %699 = vsyncadd [#allocation4], 4294965760 }
 0x13f   :  { %507 = vsyncpa [#allocation3], 1 }
 0x140   :  { %508 = vsyncpa [#allocation6], 1 }
 0x141   :  { %509 = vsyncpa [#allocation4], 1 }

</bundles_post_ra>
